<compile_context>
chip_gen: v5e
topology: v5e:2x2
jax: 0.10.0
libtpu: 0.0.40
codegen_flags: <defaults>
</compile_context>

<pallas_src>
import jax
import jax.numpy as jnp
from jax.experimental import pallas as pl
from jax.experimental.pallas import tpu as pltpu


def _round_up(n, m):
    return ((n + m - 1) // m) * m


def logreg_kernel(x_ref, w_ref, b_ref, o_ref, acc_ref):
    """One (batch-tile, feature-tile) grid step.

    x_ref:   (tb, tf)   VMEM, caller dtype
    w_ref:   (1, tf)    VMEM, f32 (resident slice of the weight row)
    b_ref:   (1, 1)     SMEM, f32
    o_ref:   (1, 1, tb) VMEM, caller dtype (lane-dense output slab)
    acc_ref: (tb, 1)    VMEM f32 scratch, partial dot products across feature tiles
    """
    f = pl.program_id(1)

    @pl.when(f == 0)
    def _init():
        acc_ref[...] = jnp.zeros_like(acc_ref)

    # GEMV partial: broadcast multiply on the VPU, lane reduction on the XLU, f32 acc.
    xf = x_ref[...].astype(jnp.float32)
    acc_ref[...] += jnp.sum(xf * w_ref[...], axis=-1, keepdims=True)

    @pl.when(f == pl.num_programs(1) - 1)
    def _finalize():
        z = acc_ref[...] + b_ref[0, 0]          # (tb, 1)
        y = 1.0 / (1.0 + jnp.exp(-z))           # exact sigmoid; exp(-z)->inf gives 0 cleanly
        # Sublane column -> lane-major slab (XLU relayout; XLU is otherwise idle here).
        o_ref[...] = y.reshape(o_ref.shape).astype(o_ref.dtype)


def _choose_tiles(B, F, itemsize, tile_bytes=8 * 1024 * 1024, good_rows=512):
    """Pick (tb, tf): batch-tile rows and feature-tile columns.

    Targets ~tile_bytes of x per tile (the biggest lever for a mem-bound GEMV). The
    feature axis is only split when keeping it whole would force the batch tile below
    `good_rows`, and only with a multiple-of-128 divisor of F (a partial feature tile
    would sum garbage columns into every row's dot product).
    """
    tf = F
    if F * good_rows * itemsize > tile_bytes:
        max_cols128 = max(tile_bytes // (good_rows * itemsize * 128), 1)
        for c in range(max_cols128, 0, -1):
            if F % (c * 128) == 0:
                tf = c * 128
                break
        # No clean divisor -> keep tf = F and let tb shrink (correct, just less optimal).

    tb = max((tile_bytes // (tf * itemsize)) // 8 * 8, 8)
    tb = min(tb, _round_up(B, 8))
    # Keep at least 2 batch steps when the batch allows it, so v7x's two TensorCores
    # both get work from the "parallel" axis (negligible extra cost on v5e/v6e).
    if B > 8:
        tb = min(tb, _round_up(pl.cdiv(B, 2), 8))
    return tb, tf


@jax.jit
def logistic_regression(x, w, b):
    """x: (B, F), w: (1, F) PyTorch nn.Linear weight layout, b: (1,).

    Returns sigmoid(x @ w.T + b) with shape (B, 1), in x's dtype.
    """
    B, F = x.shape
    w_row = jnp.asarray(w, jnp.float32).reshape(1, F)
    b2d = jnp.asarray(b, jnp.float32).reshape(1, 1)

    itemsize = jnp.dtype(x.dtype).itemsize
    tb, tf = _choose_tiles(B, F, itemsize)
    grid_b = pl.cdiv(B, tb)
    grid_f = pl.cdiv(F, tf)

    # TODO(synk): if a profile still shows exposed DMA at many grid steps, sweep
    # pipeline_mode=pl.Buffered(3) on the x BlockSpec (only if it fits the VMEM budget).
    out = pl.pallas_call(
        logreg_kernel,
        out_shape=jax.ShapeDtypeStruct((grid_b, 1, tb), x.dtype),
        grid=(grid_b, grid_f),
        in_specs=[
            pl.BlockSpec((tb, tf), lambda i, f: (i, f)),              # x tile (double-buffered)
            pl.BlockSpec((1, tf), lambda i, f: (0, f)),               # weight row slice
            pl.BlockSpec((1, 1), lambda i, f: (0, 0),
                         memory_space=pltpu.SMEM),                    # bias scalar
        ],
        out_specs=pl.BlockSpec((1, 1, tb), lambda i, f: (i, 0, 0)),   # lane-dense slab
        scratch_shapes=[pltpu.VMEM((tb, 1), jnp.float32)],            # f32 accumulator
        compiler_params=pltpu.CompilerParams(
            dimension_semantics=("parallel", "arbitrary"),
            # Headroom over v5e's 16 MiB default scoped limit; safely below v7x's
            # 64 MiB-per-TC physical VMEM. Actual use: 2 x-tile buffers (~16 MiB) + small.
            vmem_limit_bytes=48 * 1024 * 1024,
        ),
    )(x, w_row, b2d)
    # Flatten lane-dense tiles -> (B, 1); overhanging rows of the last tile are dropped.
    return out.reshape(-1)[:B].reshape(B, 1)


if __name__ == "__main__":
    key = jax.random.PRNGKey(0)
    kx, kw, kb = jax.random.split(key, 3)

    batch, n_features = 10, 32  # small; batch=10 exercises the overhanging-tail-tile path
    x = jax.random.normal(kx, (batch, n_features), dtype=jnp.float32)

    # nn.Linear-style init: uniform(-1/sqrt(F), 1/sqrt(F)); weight layout (1, F).
    bound = 1.0 / float(n_features) ** 0.5
    w = jax.random.uniform(kw, (1, n_features), jnp.float32, -bound, bound)
    b = jax.random.uniform(kb, (1,), jnp.float32, -bound, bound)

    y = jax.block_until_ready(logistic_regression(x, w, b))

    # Pure-JAX reference; exact sigmoid in the kernel -> tight tolerance.
    y_ref = jax.nn.sigmoid(x @ w.T + b)
    assert y.shape == (batch, 1)
    assert jnp.allclose(y, y_ref, atol=1e-5, rtol=1e-5), "mismatch vs reference"

    print("KERNEL_OK")
</pallas_src>

<mosaic_0001>
module attributes {stable_mosaic.version = 11 : i64} {
  func.func @logreg_kernel(%arg0: i32, %arg1: i32, %arg2: memref<8x32xf32, #tpu.memory_space<vmem>>, %arg3: memref<1x32xf32, #tpu.memory_space<vmem>>, %arg4: memref<1x1xf32, #tpu.memory_space<smem>>, %arg5: memref<1x1x8xf32, #tpu.memory_space<vmem>>, %arg6: memref<8x1xf32, #tpu.memory_space<vmem>>) attributes {dimension_semantics = [#tpu.dimension_semantics<parallel>, #tpu.dimension_semantics<arbitrary>], iteration_bounds = array<i64: 2, 1>, scalar_prefetch = 0 : i64, scratch_operands = 1 : i64, tpu.core_type = #tpu.core_type<tc>, window_params = [{transform_indices = @transform_0, window_bounds = array<i64: 8, 32>}, {transform_indices = @transform_1, window_bounds = array<i64: 1, 32>}, {transform_indices = @transform_2, window_bounds = array<i64: 1, 1>}, {transform_indices = @transform_3, window_bounds = array<i64: 1, 1, 8>}]} {
    %c0_i32 = arith.constant 0 : i32
    %0 = arith.cmpi eq, %arg1, %c0_i32 : i32
    %1 = arith.extui %0 : i1 to i32
    %c0_i32_0 = arith.constant 0 : i32
    %2 = arith.cmpi ne, %1, %c0_i32_0 : i32
    scf.if %2 {
      %cst_10 = arith.constant 0.000000e+00 : f32
      %15 = vector.broadcast %cst_10 : f32 to vector<8x1xf32>
      %c0_11 = arith.constant 0 : index
      %c0_12 = arith.constant 0 : index
      %16 = vector.load %arg6[%c0_11, %c0_12] : memref<8x1xf32, #tpu.memory_space<vmem>>, vector<8x1xf32>
      tpu.vector_store %arg6[%c0_11, %c0_12], %15 {strides = array<i32>} : memref<8x1xf32, #tpu.memory_space<vmem>>, vector<8x1xf32>,
    } else {
    }
    %c0 = arith.constant 0 : index
    %c0_1 = arith.constant 0 : index
    %3 = vector.load %arg2[%c0, %c0_1] : memref<8x32xf32, #tpu.memory_space<vmem>>, vector<8x32xf32>
    %c0_2 = arith.constant 0 : index
    %c0_3 = arith.constant 0 : index
    %4 = vector.load %arg6[%c0_2, %c0_3] : memref<8x1xf32, #tpu.memory_space<vmem>>, vector<8x1xf32>
    %c0_4 = arith.constant 0 : index
    %c0_5 = arith.constant 0 : index
    %5 = vector.load %arg3[%c0_4, %c0_5] : memref<1x32xf32, #tpu.memory_space<vmem>>, vector<1x32xf32>
    %6 = vector.broadcast %5 : vector<1x32xf32> to vector<8x32xf32>
    %7 = arith.mulf %3, %6 : vector<8x32xf32>
    %cst = arith.constant dense<0.000000e+00> : vector<8xf32>
    %8 = vector.multi_reduction <add>, %7, %cst [1] : vector<8x32xf32> to vector<8xf32>
    %9 = vector.shape_cast %8 : vector<8xf32> to vector<8x1xf32>
    %10 = arith.addf %4, %9 : vector<8x1xf32>
    %c0_6 = arith.constant 0 : index
    %c0_7 = arith.constant 0 : index
    %11 = vector.load %arg6[%c0_6, %c0_7] : memref<8x1xf32, #tpu.memory_space<vmem>>, vector<8x1xf32>
    tpu.vector_store %arg6[%c0_6, %c0_7], %10 {strides = array<i32>} : memref<8x1xf32, #tpu.memory_space<vmem>>, vector<8x1xf32>,
    %c0_i32_8 = arith.constant 0 : i32
    %12 = arith.cmpi eq, %arg1, %c0_i32_8 : i32
    %13 = arith.extui %12 : i1 to i32
    %c0_i32_9 = arith.constant 0 : i32
    %14 = arith.cmpi ne, %13, %c0_i32_9 : i32
    scf.if %14 {
      %c0_10 = arith.constant 0 : index
      %c0_11 = arith.constant 0 : index
      %15 = vector.load %arg6[%c0_10, %c0_11] : memref<8x1xf32, #tpu.memory_space<vmem>>, vector<8x1xf32>
      %c0_12 = arith.constant 0 : index
      %c0_13 = arith.constant 0 : index
      %16 = memref.load %arg4[%c0_12, %c0_13] : memref<1x1xf32, #tpu.memory_space<smem>>
      %17 = vector.broadcast %16 : f32 to vector<8x1xf32>
      %18 = arith.addf %15, %17 : vector<8x1xf32>
      %cst_14 = arith.constant 0.000000e+00 : f32
      %19 = vector.broadcast %cst_14 : f32 to vector<8x1xf32>
      %20 = arith.subf %19, %18 : vector<8x1xf32>
      %21 = math.exp %20 : vector<8x1xf32>
      %cst_15 = arith.constant 1.000000e+00 : f32
      %22 = vector.broadcast %cst_15 : f32 to vector<8x1xf32>
      %23 = arith.addf %22, %21 : vector<8x1xf32>
      %cst_16 = arith.constant 1.000000e+00 : f32
      %24 = vector.broadcast %cst_16 : f32 to vector<8x1xf32>
      %25 = arith.divf %24, %23 : vector<8x1xf32>
      %26 = vector.shape_cast %25 : vector<8x1xf32> to vector<1x1x8xf32>
      %c0_17 = arith.constant 0 : index
      %c0_18 = arith.constant 0 : index
      %c0_19 = arith.constant 0 : index
      %27 = vector.load %arg5[%c0_17, %c0_18, %c0_19] : memref<1x1x8xf32, #tpu.memory_space<vmem>>, vector<1x1x8xf32>
      tpu.vector_store %arg5[%c0_17, %c0_18, %c0_19], %26 {strides = array<i32>} : memref<1x1x8xf32, #tpu.memory_space<vmem>>, vector<1x1x8xf32>,
    } else {
    }
    return
  }
  func.func @transform_0(%arg0: i32, %arg1: i32) -> (i32, i32) {
    %c0_i32 = arith.constant 0 : i32
    return %arg0, %arg1 : i32, i32
  }
  func.func @transform_1(%arg0: i32, %arg1: i32) -> (i32, i32) {
    %c0_i32 = arith.constant 0 : i32
    %c0_i32_0 = arith.constant 0 : i32
    return %c0_i32, %arg1 : i32, i32
  }
  func.func @transform_2(%arg0: i32, %arg1: i32) -> (i32, i32) {
    %c0_i32 = arith.constant 0 : i32
    %c0_i32_0 = arith.constant 0 : i32
    %c0_i32_1 = arith.constant 0 : i32
    return %c0_i32, %c0_i32_0 : i32, i32
  }
  func.func @transform_3(%arg0: i32, %arg1: i32) -> (i32, i32, i32) {
    %c0_i32 = arith.constant 0 : i32
    %c0_i32_0 = arith.constant 0 : i32
    %c0_i32_1 = arith.constant 0 : i32
    return %arg0, %c0_i32, %c0_i32_0 : i32, i32, i32
  }
}

</mosaic_0001>

<bundles_post_ra>
// kernel: logistic_regression.1
= control target key start
LH: loop header
LB: loop body
LE: loop exit
PB: predicated region body
PF: predicated region fallthrough
CT: control target
= control target key end

     0   :  { %s624_s0 = inlined_call_operand.hbm [shape: f32[10,32], index: 0, kind: input, shape index: {}]   ;;  %s625_s1 = inlined_call_operand.vmem [shape: f32[1,32], index: 1, kind: input, shape index: {}]   ;;  %s626_s2 = inlined_call_operand.<no memory space> [shape: f32[1,1], index: 2, kind: input, shape index: {}]   ;;  %s627_s3 = inlined_call_operand.vmem [shape: f32[2,1,8], index: 3, kind: output, shape index: {}]  }
   0x1   :  { %8 = sst [smem:[#allocation3]] %s626_s2 }
   0x2   :  { %9 = vsyncpa [#allocation5], 0 }
   0x3   :  { %11 = vsyncpa [#allocation5 + $0x1], 0  ;;  %s533_s14 = smov 0   ;;  %s535_s15 = smov 0  }
   0x4   :  { %s537_s16 = smov 0   ;;  %s539_s17 = smov 0  }
   0x5   :  { %s541_s18 = smov 0   ;;  %s543_s19 = smov 0  }
   0x6 LB: > { %s352_s2 = sadd.s32 4294967295, %s506_s19   ;;  %s29_s20 = sadd.s32 1, %s502_s18  ;;  %s506_s19 = sphi %s543_s19, %s17_s19   ;;  %s502_s18 = sphi %s541_s18, %s634_s18   ;;  %s498_s17 = sphi %s539_s17, %s633_s17   ;;  %s494_s16 = sphi %s537_s16, %s632_s16   ;;  %s490_s15 = sphi %s535_s15, %s631_s15   ;;  %s486_s14 = sphi %s533_s14, %s630_s14  }
   0x7   : > { %p31_p0 = scmp.ge.s32.totalorder %s29_s20, 2  ;;  %s38_s21 = sadd.s32 1, %s494_s16 }
   0x8   : > { %p45_p1 = scmp.ne.s32.totalorder %s494_s16, %s490_s15  ;;  %p46_p2 = scmp.eq.s32.totalorder %s506_s19, 0 }
   0x9   : > { %s636_s20 = smov (%p31_p0, %s29_s20), 0  ;;  %p51_p4 = scmp.ne.s32.totalorder %s490_s15, %s486_s14 }
   0xa   : > { %p569_p3 = por %p46_p2, %p45_p1  ;;  %s33_s23 = ssub.s32 %s502_s18, %s636_s20 }
   0xb   : > { %p52_p5 = scmp.eq.s32.totalorder %s352_s2, 0  ;;  %p36_p6 = scmp.eq.s32.totalorder %s33_s23, 0 }
   0xc   : > { %p369_p8 = scmp.lt.s32.totalorder %s506_s19, 2  ;;  %s157_s26 = sand.u32 1, %s494_s16  }
   0xd   : > { %p576_p7 = por %p52_p5, %p51_p4  ;;  %s358_s27 = sshll.u32 %s502_s18, 3 }
   0xe   : > { %s582_s25 = scalar_select %p36_p6, %s494_s16, %s38_s21  }
   0xf   : > { %s357_s28 = sshll.u32 %s157_s26, 3  ;;  %s166_s4 = scalar_lea.hbm %s624_s0, %s358_s27 }
  0x10   : > { %s168_s5 = sshll.u32 %s166_s4, 4  ;;  %s161_s6 = scalar_lea.vmem [#allocation4], %s357_s28  ;;  %s169_s5 = int_to_ptr.hbm [resolvable:$true] %s168_s5 }
  0x11   : > { %s170_s7 = sshll.u32 %s161_s6, 4  ;;  %p366_p9 = pnand %p369_p8, %p569_p3  ;;  %s171_s7 = int_to_ptr.vmem [resolvable:$true] %s170_s7 }
  0x12   : > { %p359_p10 = scmp.ge.s32.totalorder %s506_s19, 1  ;;  %p175_p11 = scmp.lt.s32.totalorder %s506_s19, 3 }
  0x13   : > { %s158_s8 = scalar_lea.sflag [#allocation5], %s157_s26 }
  0x14   : > { %368 = dma.hbm_to_vmem [thread:$0]  (!%p366_p9), %s169_s5, 128, %s171_s7, %s158_s8  }
  0x15   : > { %p176_p12 = pnand %p359_p10, %p175_p11 }
  0x16   : > { %s181_s9 = sand.u32 (!%p176_p12), 1, %s490_s15  }
  0x17   : > { %179 = sbr.rel (%p176_p12) target bundleno = 309 (0x135), region = 32  ;;  %s360_s10 = sshll.u32 (!%p176_p12), %s181_s9, 3 }
  0x18   : > { %s182_s11 = scalar_lea.sflag (!%p176_p12), [#allocation5], %s181_s9  ;;  %s185_s12 = scalar_lea.vmem (!%p176_p12), [#allocation4], %s360_s10 }
  0x1c   : > { %481 = dma.done.wait (%p576_p7), %s182_s11, 128  }
  0x1d   : > { %483 = vsyncadd (%p576_p7), %s182_s11, 4294967168  ;;  %vm220_vm0 = vcmask 7168   ;;  %v508_v0 = vmov 0.0   ;;  %v222_v1 = vld [vmem:[%s185_s12] sm:$0xff]  ;;  %v421_v2 = vld [vmem:[%s625_s1] ss:$0 sm:$0xff]  ;;  %v266_v26 = vlaneseq }
  0x1e   : > { %221 = vst.msk [vmem:[#allocation2] sm:$0xff] %vm220_vm0, %v508_v0  ;;  %vm229_vm1 = vcmask 261120   ;;  %v228_v3 = vmul.f32 %v421_v2, %v222_v1  ;;  %v509_v5 = vmov 0   ;;  %s240_s2 = sld [smem:[#allocation3]]  ;;  %p213_p13 = scmp.lt.s32.totalorder %s498_s17, 1  ;;  %vm270_vm6 = vcmask 57344  }
  0x1f   : > { %420 = vset.pattern.permute.xlu0 %v509_v5  ;;  %v267_v27 = vand.u32 127, %v266_v26 }
  0x20   : > { %v230_v4 = vsel %vm229_vm1, %v228_v3, 0.0  ;;  %s638_s17 = smov (!%p213_p13, %s498_s17), 1 }
  0x21   : > { %231 = vadd.xlane.f32.xlu0 %v230_v4  ;;  %s215_s23 = scalar_lea.vmem %s627_s3, %s638_s17 }
  0x24   : > { %v241_v9 = vstv %s240_s2 }
  0x25   : > { %v223_v6 = vld [vmem:[#allocation2] sm:$0xff] }
  0x94   : > { %v232_v7 = vpop.xlane.xlu0 %231 }
  0x95   : > { %v233_v8 = vadd.f32 %v232_v7, %v223_v6 }
  0x97   : > { %235 = vst.msk [vmem:[#allocation2] sm:$0xff] %vm220_vm0, %v233_v8 }
  0x9e   : > { %v239_v10 = vld [vmem:[#allocation2] sm:$0xff] }
  0x9f   : > { %v242_v11 = vadd.f32 %v241_v9, %v239_v10 }
  0xa1   : > { %v243_v12 = vsub.f32 0.0, %v242_v11 }
  0xa3   : > { %v244_v13 = vmul.f32 1.442695, %v243_v12 }
  0xa5   : > { %422 = vpow2.f32 %v244_v13 }
  0xab   : > { %v423_v14 = vpop.eup %422 }
  0xac   : > { %v246_v15 = vadd.f32 1.0, %v423_v14 }
  0xae   : > { %424 = vrcp.f32 %v246_v15  ;;  %v258_v19 = vand.u32 2147483648, %v246_v15  ;;  %v256_v21 = vand.u32 2147483647, %v246_v15  ;;  %vm252_vm3 = vweird.f32 %v246_v15 }
  0xb0   : > { %v259_v23 = vor.u32 1.1754944e-38, %v258_v19  ;;  %vm257_vm5 = vcmp.eq.f32.partialorder %v256_v21, 8.507059e+37 }
  0xb4   : > { %v425_v16 = vpop.eup %424 }
  0xb5   : > { %v248_v17 = vmul.f32 %v425_v16, %v246_v15  ;;  %vm253_vm2 = vweird.f32 %v425_v16 }
  0xb6   : > { %vm254_vm4 = vmor %vm252_vm3, %vm253_vm2 }
  0xb7   : > { %v249_v18 = vsub.f32 1.0, %v248_v17 }
  0xb9   : > { %v250_v20 = vmul.f32 %v425_v16, %v249_v18 }
  0xbb   : > { %v251_v22 = vadd.f32 %v425_v16, %v250_v20 }
  0xbd   : > { %v255_v24 = vsel %vm254_vm4, %v425_v16, %v251_v22 }
  0xbe   : > { %v260_v25 = vsel %vm257_vm5, %v259_v23, %v255_v24 }
  0xbf   : > { %264 = vperm.xlu0 %420, %v260_v25  }
 0x131   : > { %v265_v28 = vpop.permute.xlu0 %264 }
 0x132   : > { %v268_v29 = vperm.slane %v265_v28, %v267_v27 }
 0x134   : > { %271 = vst.msk [vmem:[%s215_s23] sm:$0x1] %vm270_vm6, %v268_v29 }
 0x135 PF: > { %s17_s19 = sadd.s32 1, %s506_s19   ;;  %s630_s14 = smov %s490_s15 }
 0x136   : > { %p14_p0 = scmp.ge.s32.totalorder %s17_s19, 4   ;;  %s631_s15 = smov %s494_s16 }
 0x137   : > { %s632_s16 = smov %s582_s25  ;;  %s633_s17 = smov %s502_s18 }
 0x138   : > { %s634_s18 = smov %s636_s20  ;;  %16 = sbr.rel (!%p14_p0) target bundleno = 6 (0x6), region = 83 }
 0x13d   :  { %289 = vsyncpa [#allocation5], 1 }
 0x13e   :  { %291 = vsyncpa [#allocation5 + $0x1], 1 }

</bundles_post_ra>
